<compile_context>
chip_gen: v5e
topology: v5e:2x2
jax: 0.10.0
libtpu: 0.0.40
codegen_flags: <defaults>
</compile_context>

<pallas_src>
from functools import partial

import numpy as np
import jax
import jax.numpy as jnp
from jax.experimental import pallas as pl
from jax.experimental.pallas import tpu as pltpu

# Lane (node) tile cap.  A single grid step costs ~0.35us, so we use the largest
# tile that fits comfortably in VMEM; tiles are kept a multiple of 128 lanes when
# the node axis is tiled so that all loads/stores stay lane-dense.
_LANE_TILE_CAP = 1024


def _lane_tile(bn):
    if bn <= _LANE_TILE_CAP:
        return bn                              # one tile covers all nodes
    return (_LANE_TILE_CAP // 128) * 128       # lane-dense (multiple of 128)


# ----------------------------- fused Pallas kernel ----------------------------

def _mp_conv_fused_kernel(
        # data blocks (channel-first, node index on lanes)
        node_ref, knn_ref, pw_ref, et_ref,
        # weight_dy_graph.nodeCnn  (first conv split over the [self | knn] halves)
        wdyn_w1s, wdyn_w1k, wdyn_b1, wdyn_w2, wdyn_b2,
        # weight_dy_graph.weightCnnPure
        wdyp_w1, wdyp_b1, wdyp_w2, wdyp_b2,
        # weight_dy_graph.weightCnnPlus
        wdyq_w1, wdyq_b1, wdyq_w2, wdyq_b2,
        # weight_dy_graph.weightMix
        wdym_w1, wdym_b1, wdym_w2, wdym_b2,
        # mp_conv_v2.nodeCnn
        nd_w1s, nd_w1k, nd_b1, nd_w2, nd_b2,
        # mp_conv_v2.weightCnn
        wt_w1, wt_b1, wt_w2, wt_b2,
        # combine / aggregation parameters
        wfn_t, f2_wide, nfil_wide, bias, bn_scale, bn_shift,
        # outputs
        fw_ref, nfeat_ref,
        # scratch
        acc_ref,
        *, nedge, nout):
    j = pl.program_id(1)                 # neighbour index (reduction axis)
    last_j = pl.num_programs(1) - 1

    node = node_ref[...]                 # (nin, t)  self node features (per node)
    knn = knn_ref[...]                   # (nin, t)  gathered neighbour-j features
    pw = pw_ref[...]                     # (win, t)  pair weights for neighbour j

    def mlp_pair(w1s, w1k, b1, w2, b2):
        # conv1x1 (BN folded) -> ReLU -> conv1x1 on the concat([self, knn]) input;
        # the concat never materializes: the first layer is split into two dots.
        h = (jnp.dot(w1s[...], node, preferred_element_type=jnp.float32)
             + jnp.dot(w1k[...], knn, preferred_element_type=jnp.float32)
             + b1[...])
        h = jnp.maximum(h, 0.0)
        return jnp.dot(w2[...], h, preferred_element_type=jnp.float32) + b2[...]

    def mlp(w1, b1, w2, b2, x):
        h = jnp.maximum(
            jnp.dot(w1[...], x, preferred_element_type=jnp.float32) + b1[...], 0.0)
        return jnp.dot(w2[...], h, preferred_element_type=jnp.float32) + b2[...]

    # ---- weight_dy_graph branch -> final_weight for neighbour j ----
    wdy_nf = mlp_pair(wdyn_w1s, wdyn_w1k, wdyn_b1, wdyn_w2, wdyn_b2)    # (med,  t)
    wdy_og = mlp(wdyp_w1, wdyp_b1, wdyp_w2, wdyp_b2, pw)                # (med,  t)
    wdy_plus = mlp(wdyq_w1, wdyq_b1, wdyq_w2, wdyq_b2, pw)              # (med,  t)
    fw_ref[...] = mlp(wdym_w1, wdym_b1, wdym_w2, wdym_b2,
                      wdy_og + wdy_nf * wdy_plus)                       # (wout, t)

    # ---- main branch ----
    pnf = mlp_pair(nd_w1s, nd_w1k, nd_b1, nd_w2, nd_b2)                 # (nout, t)
    pwf = mlp(wt_w1, wt_b1, wt_w2, wt_b2, pw)                           # (wout, t)

    mediate = jnp.dot(wfn_t[...], pwf, preferred_element_type=jnp.float32)   # (nout, t)
    x = pnf * mediate

    # One wide matmul over all edge types instead of `nedge` tiny ones; the
    # node-feature projection uses the per-node features directly (no k-fold
    # duplication of the matmul or its HBM read).
    ef = jnp.dot(f2_wide[...], x, preferred_element_type=jnp.float32)        # (E*nout, t)
    nfp = jnp.dot(nfil_wide[...], node, preferred_element_type=jnp.float32)  # (E*nout, t)
    s = ef + nfp
    et = et_ref[...]                                                         # (E, t)

    cur = bias[...]                                    # (nout, 1), broadcasts over lanes
    for e in range(nedge):                             # E is tiny and static
        cur = cur + s[e * nout:(e + 1) * nout, :] * et[e:e + 1, :]

    @pl.when(j == 0)
    def _():
        acc_ref[...] = jnp.full(acc_ref.shape, -jnp.inf, dtype=acc_ref.dtype)

    acc_ref[...] = jnp.maximum(acc_ref[...], cur)      # max aggregation over neighbours

    @pl.when(j == last_j)
    def _():
        # folded eval-mode BatchNorm affine + ReLU, written once per node tile
        nfeat_ref[...] = jnp.maximum(
            acc_ref[...] * bn_scale[...] + bn_shift[...], 0.0)


# ----------------------------- parameter preparation --------------------------

def bn_affine(gamma, beta, mean, var, eps=1e-5):
    s = gamma / jnp.sqrt(var + eps)
    return s, beta - mean * s


def fold_block(blk, eps=1e-5):
    """Fold eval-mode BN into the first 1x1 conv of a conv-BN-ReLU-conv block."""
    s, t = bn_affine(blk['gamma'], blk['beta'], blk['mean'], blk['var'], eps)
    return blk['w1'] * s[None, :], blk['b1'] * s + t, blk['w2'], blk['b2']


def _fold_block_t(blk):
    """Channel-first (transposed) folded weights for the kernel."""
    w1, b1, w2, b2 = fold_block(blk)
    return w1.T, b1[:, None], w2.T, b2[:, None]


def _fold_pair_block_t(blk, nin):
    """Same, with the first conv split over the [self | knn] input halves."""
    w1t, b1, w2t, b2 = _fold_block_t(blk)
    return w1t[:, :nin], w1t[:, nin:], b1, w2t, b2


def _kernel_weights(params):
    nedge, nin, nout = params['nfilter'].shape
    scale, shift = bn_affine(params['bn_gamma'], params['bn_beta'],
                             params['bn_mean'], params['bn_var'])
    return (
        *_fold_pair_block_t(params['wdy_node'], nin),
        *_fold_block_t(params['wdy_pure']),
        *_fold_block_t(params['wdy_plus']),
        *_fold_block_t(params['wdy_mix']),
        *_fold_pair_block_t(params['node'], nin),
        *_fold_block_t(params['weight']),
        params['wfilter_node'].T,                                            # (nout, wout)
        jnp.transpose(params['filters2'], (0, 2, 1)).reshape(nedge * nout, nout),
        jnp.transpose(params['nfilter'], (0, 2, 1)).reshape(nedge * nout, nin),
        params['bias'][:, None],
        scale[:, None],
        shift[:, None],
    )


def init_block(key, cin, h, cout):
    ks = jax.random.split(key, 8)
    return dict(
        w1=jax.random.uniform(ks[0], (cin, h), jnp.float32, -0.1, 0.1),
        b1=jax.random.uniform(ks[1], (h,), jnp.float32, -0.05, 0.05),
        gamma=1.0 + 0.1 * jax.random.normal(ks[2], (h,), jnp.float32),
        beta=0.05 * jax.random.normal(ks[3], (h,), jnp.float32),
        mean=0.05 * jax.random.normal(ks[4], (h,), jnp.float32),
        var=1.0 + 0.1 * jax.random.uniform(ks[5], (h,), jnp.float32),
        w2=jax.random.uniform(ks[6], (h, cout), jnp.float32, -0.1, 0.1),
        b2=jax.random.uniform(ks[7], (cout,), jnp.float32, -0.05, 0.05),
    )


def init_params(key, nin, nout, win, wout, nedge):
    med = 3 * nin
    ks = jax.random.split(key, 12)
    return {
        # weight_dy_graph(nin, 3*nin, win, wout)
        'wdy_node': init_block(ks[0], 2 * nin, med // 2, med),
        'wdy_plus': init_block(ks[1], win, med // 2, med),
        'wdy_pure': init_block(ks[2], win, med // 2, med),
        'wdy_mix':  init_block(ks[3], med, wout, wout),
        # main trunk
        'node':     init_block(ks[4], 2 * nin, nout // 2, nout),
        'weight':   init_block(ks[5], win, wout // 2, wout),
        'wfilter_node': jax.random.uniform(ks[6], (wout, nout), jnp.float32, -0.01, 0.01),
        # nfilter[e, i, o] <-> torch nfilter[i, o*E+e];  filters2[e, i, o] <-> torch filters2[i, o, e]
        'nfilter':  jax.random.uniform(ks[7], (nedge, nin, nout), jnp.float32, -0.01, 0.01),
        'filters2': jax.random.uniform(ks[8], (nedge, nout, nout), jnp.float32, -0.01, 0.01),
        'bias':     jax.random.uniform(ks[9], (nout,), jnp.float32, 0.0, 0.05),
        'bn_gamma': 1.0 + 0.1 * jax.random.normal(ks[10], (nout,), jnp.float32),
        'bn_beta':  0.05 * jax.random.normal(ks[11], (nout,), jnp.float32),
        'bn_mean':  jnp.zeros((nout,), jnp.float32),
        'bn_var':   jnp.ones((nout,), jnp.float32),
    }


# ----------------------------- forward pass -----------------------------------

def mp_conv_v2_forward(params, node_feature, pair_weight, nn_idx, etype):
    B, nin, N, _ = node_feature.shape
    K = nn_idx.shape[2]
    win = pair_weight.shape[1]
    E = etype.shape[1]
    nout = params['bias'].shape[0]
    wout = params['wfilter_node'].shape[0]
    bn = B * N

    # --- XLA glue: neighbour gather + NCHW -> channel-first (node on lanes) ---
    nf_sq = node_feature[..., 0]                                           # (B, nin, N)
    idx = jnp.broadcast_to(nn_idx.reshape(B, 1, N * K), (B, nin, N * K))
    nknn = jnp.take_along_axis(nf_sq, idx, axis=2).reshape(B, nin, N, K)   # (B, nin, N, K)

    node_c = jnp.transpose(nf_sq, (1, 0, 2)).reshape(nin, bn)              # (nin, B*N)
    knn_kc = jnp.transpose(nknn, (3, 1, 0, 2)).reshape(K, nin, bn)         # (K, nin, B*N)
    pw_kc = jnp.transpose(pair_weight, (3, 1, 0, 2)).reshape(K, win, bn)   # (K, win, B*N)
    et_kc = jnp.transpose(etype, (3, 1, 0, 2)).reshape(K, E, bn)           # (K, E,  B*N)

    weights = _kernel_weights(params)

    tn = _lane_tile(bn)
    grid = (pl.cdiv(bn, tn), K)        # node tiles (parallel) x neighbours (reduction)

    def full_spec(arr):                # whole (tiny) weight array, resident in VMEM
        zeros = (0,) * arr.ndim
        return pl.BlockSpec(arr.shape, lambda i, j, zeros=zeros: zeros)

    in_specs = [
        pl.BlockSpec((nin, tn), lambda i, j: (0, i)),            # node_c (per node)
        pl.BlockSpec((None, nin, tn), lambda i, j: (j, 0, i)),   # knn_kc (per edge)
        pl.BlockSpec((None, win, tn), lambda i, j: (j, 0, i)),   # pw_kc  (per edge)
        pl.BlockSpec((None, E, tn), lambda i, j: (j, 0, i)),     # et_kc  (per edge)
    ] + [full_spec(w) for w in weights]

    out_shape = (jax.ShapeDtypeStruct((K, wout, bn), jnp.float32),
                 jax.ShapeDtypeStruct((nout, bn), jnp.float32))
    out_specs = (pl.BlockSpec((None, wout, tn), lambda i, j: (j, 0, i)),
                 pl.BlockSpec((nout, tn), lambda i, j: (0, i)))

    fw_out, nfeat_out = pl.pallas_call(
        partial(_mp_conv_fused_kernel, nedge=E, nout=nout),
        out_shape=out_shape,
        grid=grid,
        in_specs=in_specs,
        out_specs=out_specs,
        scratch_shapes=[pltpu.VMEM((nout, tn), jnp.float32)],
        compiler_params=pltpu.CompilerParams(
            dimension_semantics=("parallel", "arbitrary")),
    )(node_c, knn_kc, pw_kc, et_kc, *weights)

    # back to the PyTorch output layouts
    nfeature = jnp.transpose(nfeat_out.reshape(nout, B, N), (1, 0, 2))[..., None]  # (B, nout, N, 1)
    final_weight = jnp.transpose(fw_out.reshape(K, wout, B, N), (2, 1, 3, 0))      # (B, wout, N, K)
    return nfeature, final_weight


# ----------------------------- pure-JAX reference -------------------------------

def ref_forward(params, node_feature, pair_weight, nn_idx, etype):
    B, nin, N, _ = node_feature.shape
    K = nn_idx.shape[2]
    E = etype.shape[1]
    nout = params['bias'].shape[0]

    nf_sq = node_feature[..., 0]
    idx = jnp.broadcast_to(nn_idx.reshape(B, 1, N * K), (B, nin, N * K))
    nknn = jnp.take_along_axis(nf_sq, idx, axis=2).reshape(B, nin, N, K)
    nself = jnp.broadcast_to(node_feature, (B, nin, N, K))
    paired = jnp.concatenate([nself, nknn], axis=1)                     # (B, 2nin, N, K)

    def rows(t):  # (B, C, N, K) -> (B*N*K, C), same row order as torch permute(0,2,3,1)
        return jnp.transpose(t, (0, 2, 3, 1)).reshape(-1, t.shape[1])

    pnf_rows, pw_rows, et_rows, nfb_rows = (rows(paired), rows(pair_weight),
                                            rows(etype), rows(nself))

    def mlp(x, blk):
        w1, b1, w2, b2 = fold_block(blk)
        return jnp.maximum(x @ w1 + b1[None, :], 0.0) @ w2 + b2[None, :]

    wdy_nf = mlp(pnf_rows, params['wdy_node'])
    wdy_og = mlp(pw_rows, params['wdy_pure'])
    wdy_plus = mlp(pw_rows, params['wdy_plus'])
    w1, b1, w2, b2 = fold_block(params['wdy_mix'])
    fw_rows = jnp.maximum((wdy_og + wdy_nf * wdy_plus) @ w1 + b1[None, :],
                          0.0) @ w2 + b2[None, :]

    pnf_feat = mlp(pnf_rows, params['node'])
    pwf_feat = mlp(pw_rows, params['weight'])

    mediate = pwf_feat @ params['wfilter_node']
    x = pnf_feat * mediate
    acc = jnp.zeros_like(x)
    for e in range(E):
        acc = acc + (x @ params['filters2'][e]
                     + nfb_rows @ params['nfilter'][e]) * et_rows[:, e:e + 1]
    acc = acc + params['bias'][None, :]
    red = jnp.max(acc.reshape(B * N, K, nout), axis=1)
    scale, shift = bn_affine(params['bn_gamma'], params['bn_beta'],
                             params['bn_mean'], params['bn_var'])
    red = jnp.maximum(red * scale[None, :] + shift[None, :], 0.0)

    wout = fw_rows.shape[1]
    nfeature = jnp.transpose(red.reshape(B, N, nout), (0, 2, 1))[..., None]
    final_weight = jnp.transpose(fw_rows.reshape(B, N, K, wout), (0, 3, 1, 2))
    return nfeature, final_weight


# ----------------------------------- main ---------------------------------------

if __name__ == "__main__":
    B, N, K = 2, 16, 8            # batch, nodes, neighbours
    nin, nout, win, wout, E = 4, 8, 6, 8, 3

    key = jax.random.PRNGKey(0)
    kp, kx = jax.random.split(key)
    params = init_params(kp, nin, nout, win, wout, E)

    k1, k2, k3, k4 = jax.random.split(kx, 4)
    node_feature = jax.random.normal(k1, (B, nin, N, 1), jnp.float32)
    pair_weight = jax.random.normal(k2, (B, win, N, K), jnp.float32)
    nn_idx = jax.random.randint(k3, (B, N, K), 0, N, jnp.int32)
    etype = jax.random.uniform(k4, (B, E, N, K), jnp.float32)

    fwd = jax.jit(mp_conv_v2_forward)
    nfeat, final_w = jax.block_until_ready(
        fwd(params, node_feature, pair_weight, nn_idx, etype))

    nfeat_ref, final_w_ref = ref_forward(params, node_feature, pair_weight, nn_idx, etype)
    np.testing.assert_allclose(np.asarray(nfeat), np.asarray(nfeat_ref),
                               rtol=2e-2, atol=5e-4)
    np.testing.assert_allclose(np.asarray(final_w), np.asarray(final_w_ref),
                               rtol=2e-2, atol=5e-4)

    assert nfeat.shape == (B, nout, N, 1)
    assert final_w.shape == (B, wout, N, K)
    print("KERNEL_OK")
</pallas_src>

<mosaic_0001>
module attributes {stable_mosaic.version = 11 : i64} {
  func.func @_mp_conv_fused_kernel(%arg0: i32, %arg1: i32, %arg2: memref<4x32xf32, #tpu.memory_space<vmem>>, %arg3: memref<1x4x32xf32, #tpu.memory_space<vmem>>, %arg4: memref<1x6x32xf32, #tpu.memory_space<vmem>>, %arg5: memref<1x3x32xf32, #tpu.memory_space<vmem>>, %arg6: memref<6x4xf32, #tpu.memory_space<vmem>>, %arg7: memref<6x4xf32, #tpu.memory_space<vmem>>, %arg8: memref<6x1xf32, #tpu.memory_space<vmem>>, %arg9: memref<12x6xf32, #tpu.memory_space<vmem>>, %arg10: memref<12x1xf32, #tpu.memory_space<vmem>>, %arg11: memref<6x6xf32, #tpu.memory_space<vmem>>, %arg12: memref<6x1xf32, #tpu.memory_space<vmem>>, %arg13: memref<12x6xf32, #tpu.memory_space<vmem>>, %arg14: memref<12x1xf32, #tpu.memory_space<vmem>>, %arg15: memref<6x6xf32, #tpu.memory_space<vmem>>, %arg16: memref<6x1xf32, #tpu.memory_space<vmem>>, %arg17: memref<12x6xf32, #tpu.memory_space<vmem>>, %arg18: memref<12x1xf32, #tpu.memory_space<vmem>>, %arg19: memref<8x12xf32, #tpu.memory_space<vmem>>, %arg20: memref<8x1xf32, #tpu.memory_space<vmem>>, %arg21: memref<8x8xf32, #tpu.memory_space<vmem>>, %arg22: memref<8x1xf32, #tpu.memory_space<vmem>>, %arg23: memref<4x4xf32, #tpu.memory_space<vmem>>, %arg24: memref<4x4xf32, #tpu.memory_space<vmem>>, %arg25: memref<4x1xf32, #tpu.memory_space<vmem>>, %arg26: memref<8x4xf32, #tpu.memory_space<vmem>>, %arg27: memref<8x1xf32, #tpu.memory_space<vmem>>, %arg28: memref<4x6xf32, #tpu.memory_space<vmem>>, %arg29: memref<4x1xf32, #tpu.memory_space<vmem>>, %arg30: memref<8x4xf32, #tpu.memory_space<vmem>>, %arg31: memref<8x1xf32, #tpu.memory_space<vmem>>, %arg32: memref<8x8xf32, #tpu.memory_space<vmem>>, %arg33: memref<24x8xf32, #tpu.memory_space<vmem>>, %arg34: memref<24x4xf32, #tpu.memory_space<vmem>>, %arg35: memref<8x1xf32, #tpu.memory_space<vmem>>, %arg36: memref<8x1xf32, #tpu.memory_space<vmem>>, %arg37: memref<8x1xf32, #tpu.memory_space<vmem>>, %arg38: memref<1x8x32xf32, #tpu.memory_space<vmem>>, %arg39: memref<8x32xf32, #tpu.memory_space<vmem>>, %arg40: memref<8x32xf32, #tpu.memory_space<vmem>>) attributes {dimension_semantics = [#tpu.dimension_semantics<parallel>, #tpu.dimension_semantics<arbitrary>], iteration_bounds = array<i64: 1, 8>, scalar_prefetch = 0 : i64, scratch_operands = 1 : i64, tpu.core_type = #tpu.core_type<tc>, window_params = [{transform_indices = @transform_0, window_bounds = array<i64: 4, 32>}, {transform_indices = @transform_1, window_bounds = array<i64: 1, 4, 32>}, {transform_indices = @transform_2, window_bounds = array<i64: 1, 6, 32>}, {transform_indices = @transform_3, window_bounds = array<i64: 1, 3, 32>}, {pipeline_mode = #tpu.pipeline_mode<synchronous>, transform_indices = @transform_4, window_bounds = array<i64: 6, 4>}, {pipeline_mode = #tpu.pipeline_mode<synchronous>, transform_indices = @transform_5, window_bounds = array<i64: 6, 4>}, {pipeline_mode = #tpu.pipeline_mode<synchronous>, transform_indices = @transform_6, window_bounds = array<i64: 6, 1>}, {pipeline_mode = #tpu.pipeline_mode<synchronous>, transform_indices = @transform_7, window_bounds = array<i64: 12, 6>}, {pipeline_mode = #tpu.pipeline_mode<synchronous>, transform_indices = @transform_8, window_bounds = array<i64: 12, 1>}, {pipeline_mode = #tpu.pipeline_mode<synchronous>, transform_indices = @transform_9, window_bounds = array<i64: 6, 6>}, {pipeline_mode = #tpu.pipeline_mode<synchronous>, transform_indices = @transform_10, window_bounds = array<i64: 6, 1>}, {pipeline_mode = #tpu.pipeline_mode<synchronous>, transform_indices = @transform_11, window_bounds = array<i64: 12, 6>}, {pipeline_mode = #tpu.pipeline_mode<synchronous>, transform_indices = @transform_12, window_bounds = array<i64: 12, 1>}, {pipeline_mode = #tpu.pipeline_mode<synchronous>, transform_indices = @transform_13, window_bounds = array<i64: 6, 6>}, {pipeline_mode = #tpu.pipeline_mode<synchronous>, transform_indices = @transform_14, window_bounds = array<i64: 6, 1>}, {pipeline_mode = #tpu.pipeline_mode<synchronous>, transform_indices = @transform_15, window_bounds = array<i64: 12, 6>}, {pipeline_mode = #tpu.pipeline_mode<synchronous>, transform_indices = @transform_16, window_bounds = array<i64: 12, 1>}, {pipeline_mode = #tpu.pipeline_mode<synchronous>, transform_indices = @transform_17, window_bounds = array<i64: 8, 12>}, {pipeline_mode = #tpu.pipeline_mode<synchronous>, transform_indices = @transform_18, window_bounds = array<i64: 8, 1>}, {pipeline_mode = #tpu.pipeline_mode<synchronous>, transform_indices = @transform_19, window_bounds = array<i64: 8, 8>}, {pipeline_mode = #tpu.pipeline_mode<synchronous>, transform_indices = @transform_20, window_bounds = array<i64: 8, 1>}, {pipeline_mode = #tpu.pipeline_mode<synchronous>, transform_indices = @transform_21, window_bounds = array<i64: 4, 4>}, {pipeline_mode = #tpu.pipeline_mode<synchronous>, transform_indices = @transform_22, window_bounds = array<i64: 4, 4>}, {pipeline_mode = #tpu.pipeline_mode<synchronous>, transform_indices = @transform_23, window_bounds = array<i64: 4, 1>}, {pipeline_mode = #tpu.pipeline_mode<synchronous>, transform_indices = @transform_24, window_bounds = array<i64: 8, 4>}, {pipeline_mode = #tpu.pipeline_mode<synchronous>, transform_indices = @transform_25, window_bounds = array<i64: 8, 1>}, {pipeline_mode = #tpu.pipeline_mode<synchronous>, transform_indices = @transform_26, window_bounds = array<i64: 4, 6>}, {pipeline_mode = #tpu.pipeline_mode<synchronous>, transform_indices = @transform_27, window_bounds = array<i64: 4, 1>}, {pipeline_mode = #tpu.pipeline_mode<synchronous>, transform_indices = @transform_28, window_bounds = array<i64: 8, 4>}, {pipeline_mode = #tpu.pipeline_mode<synchronous>, transform_indices = @transform_29, window_bounds = array<i64: 8, 1>}, {pipeline_mode = #tpu.pipeline_mode<synchronous>, transform_indices = @transform_30, window_bounds = array<i64: 8, 8>}, {pipeline_mode = #tpu.pipeline_mode<synchronous>, transform_indices = @transform_31, window_bounds = array<i64: 24, 8>}, {pipeline_mode = #tpu.pipeline_mode<synchronous>, transform_indices = @transform_32, window_bounds = array<i64: 24, 4>}, {pipeline_mode = #tpu.pipeline_mode<synchronous>, transform_indices = @transform_33, window_bounds = array<i64: 8, 1>}, {pipeline_mode = #tpu.pipeline_mode<synchronous>, transform_indices = @transform_34, window_bounds = array<i64: 8, 1>}, {pipeline_mode = #tpu.pipeline_mode<synchronous>, transform_indices = @transform_35, window_bounds = array<i64: 8, 1>}, {transform_indices = @transform_36, window_bounds = array<i64: 1, 8, 32>}, {transform_indices = @transform_37, window_bounds = array<i64: 8, 32>}]} {
    %c0 = arith.constant 0 : index
    %c0_0 = arith.constant 0 : index
    %0 = vector.load %arg2[%c0, %c0_0] : memref<4x32xf32, #tpu.memory_space<vmem>>, vector<4x32xf32>
    %c0_1 = arith.constant 0 : index
    %c0_2 = arith.constant 0 : index
    %c0_3 = arith.constant 0 : index
    %1 = vector.load %arg3[%c0_1, %c0_2, %c0_3] : memref<1x4x32xf32, #tpu.memory_space<vmem>>, vector<1x4x32xf32>
    %2 = vector.shape_cast %1 : vector<1x4x32xf32> to vector<4x32xf32>
    %c0_4 = arith.constant 0 : index
    %c0_5 = arith.constant 0 : index
    %c0_6 = arith.constant 0 : index
    %3 = vector.load %arg4[%c0_4, %c0_5, %c0_6] : memref<1x6x32xf32, #tpu.memory_space<vmem>>, vector<1x6x32xf32>
    %4 = vector.shape_cast %3 : vector<1x6x32xf32> to vector<6x32xf32>
    %c0_7 = arith.constant 0 : index
    %c0_8 = arith.constant 0 : index
    %5 = vector.load %arg6[%c0_7, %c0_8] : memref<6x4xf32, #tpu.memory_space<vmem>>, vector<6x4xf32>
    %cst = arith.constant dense<0.000000e+00> : vector<6x32xf32>
    %6 = tpu.matmul %5, %0, %cst {dimension_numbers = #tpu.dot_dimension_numbers<[1], [0], [0], [1], [0, 0, 1, 1], [], []>} : vector<6x4xf32>, vector<4x32xf32>, vector<6x32xf32> -> vector<6x32xf32>
    %c0_9 = arith.constant 0 : index
    %c0_10 = arith.constant 0 : index
    %7 = vector.load %arg7[%c0_9, %c0_10] : memref<6x4xf32, #tpu.memory_space<vmem>>, vector<6x4xf32>
    %cst_11 = arith.constant dense<0.000000e+00> : vector<6x32xf32>
    %8 = tpu.matmul %7, %2, %cst_11 {dimension_numbers = #tpu.dot_dimension_numbers<[1], [0], [0], [1], [0, 0, 1, 1], [], []>} : vector<6x4xf32>, vector<4x32xf32>, vector<6x32xf32> -> vector<6x32xf32>
    %9 = arith.addf %6, %8 : vector<6x32xf32>
    %c0_12 = arith.constant 0 : index
    %c0_13 = arith.constant 0 : index
    %10 = vector.load %arg8[%c0_12, %c0_13] : memref<6x1xf32, #tpu.memory_space<vmem>>, vector<6x1xf32>
    %11 = vector.broadcast %10 : vector<6x1xf32> to vector<6x32xf32>
    %12 = arith.addf %9, %11 : vector<6x32xf32>
    %cst_14 = arith.constant 0.000000e+00 : f32
    %13 = vector.broadcast %cst_14 : f32 to vector<6x32xf32>
    %14 = arith.maximumf %12, %13 : vector<6x32xf32>
    %c0_15 = arith.constant 0 : index
    %c0_16 = arith.constant 0 : index
    %15 = vector.load %arg9[%c0_15, %c0_16] : memref<12x6xf32, #tpu.memory_space<vmem>>, vector<12x6xf32>
    %cst_17 = arith.constant dense<0.000000e+00> : vector<12x32xf32>
    %16 = tpu.matmul %15, %14, %cst_17 {dimension_numbers = #tpu.dot_dimension_numbers<[1], [0], [0], [1], [0, 0, 1, 1], [], []>} : vector<12x6xf32>, vector<6x32xf32>, vector<12x32xf32> -> vector<12x32xf32>
    %c0_18 = arith.constant 0 : index
    %c0_19 = arith.constant 0 : index
    %17 = vector.load %arg10[%c0_18, %c0_19] : memref<12x1xf32, #tpu.memory_space<vmem>>, vector<12x1xf32>
    %18 = vector.broadcast %17 : vector<12x1xf32> to vector<12x32xf32>
    %19 = arith.addf %16, %18 : vector<12x32xf32>
    %c0_20 = arith.constant 0 : index
    %c0_21 = arith.constant 0 : index
    %20 = vector.load %arg11[%c0_20, %c0_21] : memref<6x6xf32, #tpu.memory_space<vmem>>, vector<6x6xf32>
    %cst_22 = arith.constant dense<0.000000e+00> : vector<6x32xf32>
    %21 = tpu.matmul %20, %4, %cst_22 {dimension_numbers = #tpu.dot_dimension_numbers<[1], [0], [0], [1], [0, 0, 1, 1], [], []>} : vector<6x6xf32>, vector<6x32xf32>, vector<6x32xf32> -> vector<6x32xf32>
    %c0_23 = arith.constant 0 : index
    %c0_24 = arith.constant 0 : index
    %22 = vector.load %arg12[%c0_23, %c0_24] : memref<6x1xf32, #tpu.memory_space<vmem>>, vector<6x1xf32>
    %23 = vector.broadcast %22 : vector<6x1xf32> to vector<6x32xf32>
    %24 = arith.addf %21, %23 : vector<6x32xf32>
    %cst_25 = arith.constant 0.000000e+00 : f32
    %25 = vector.broadcast %cst_25 : f32 to vector<6x32xf32>
    %26 = arith.maximumf %24, %25 : vector<6x32xf32>
    %c0_26 = arith.constant 0 : index
    %c0_27 = arith.constant 0 : index
    %27 = vector.load %arg13[%c0_26, %c0_27] : memref<12x6xf32, #tpu.memory_space<vmem>>, vector<12x6xf32>
    %cst_28 = arith.constant dense<0.000000e+00> : vector<12x32xf32>
    %28 = tpu.matmul %27, %26, %cst_28 {dimension_numbers = #tpu.dot_dimension_numbers<[1], [0], [0], [1], [0, 0, 1, 1], [], []>} : vector<12x6xf32>, vector<6x32xf32>, vector<12x32xf32> -> vector<12x32xf32>
    %c0_29 = arith.constant 0 : index
    %c0_30 = arith.constant 0 : index
    %29 = vector.load %arg14[%c0_29, %c0_30] : memref<12x1xf32, #tpu.memory_space<vmem>>, vector<12x1xf32>
    %30 = vector.broadcast %29 : vector<12x1xf32> to vector<12x32xf32>
    %31 = arith.addf %28, %30 : vector<12x32xf32>
    %c0_31 = arith.constant 0 : index
    %c0_32 = arith.constant 0 : index
    %32 = vector.load %arg15[%c0_31, %c0_32] : memref<6x6xf32, #tpu.memory_space<vmem>>, vector<6x6xf32>
    %cst_33 = arith.constant dense<0.000000e+00> : vector<6x32xf32>
    %33 = tpu.matmul %32, %4, %cst_33 {dimension_numbers = #tpu.dot_dimension_numbers<[1], [0], [0], [1], [0, 0, 1, 1], [], []>} : vector<6x6xf32>, vector<6x32xf32>, vector<6x32xf32> -> vector<6x32xf32>
    %c0_34 = arith.constant 0 : index
    %c0_35 = arith.constant 0 : index
    %34 = vector.load %arg16[%c0_34, %c0_35] : memref<6x1xf32, #tpu.memory_space<vmem>>, vector<6x1xf32>
    %35 = vector.broadcast %34 : vector<6x1xf32> to vector<6x32xf32>
    %36 = arith.addf %33, %35 : vector<6x32xf32>
    %cst_36 = arith.constant 0.000000e+00 : f32
    %37 = vector.broadcast %cst_36 : f32 to vector<6x32xf32>
    %38 = arith.maximumf %36, %37 : vector<6x32xf32>
    %c0_37 = arith.constant 0 : index
    %c0_38 = arith.constant 0 : index
    %39 = vector.load %arg17[%c0_37, %c0_38] : memref<12x6xf32, #tpu.memory_space<vmem>>, vector<12x6xf32>
    %cst_39 = arith.constant dense<0.000000e+00> : vector<12x32xf32>
    %40 = tpu.matmul %39, %38, %cst_39 {dimension_numbers = #tpu.dot_dimension_numbers<[1], [0], [0], [1], [0, 0, 1, 1], [], []>} : vector<12x6xf32>, vector<6x32xf32>, vector<12x32xf32> -> vector<12x32xf32>
    %c0_40 = arith.constant 0 : index
    %c0_41 = arith.constant 0 : index
    %41 = vector.load %arg18[%c0_40, %c0_41] : memref<12x1xf32, #tpu.memory_space<vmem>>, vector<12x1xf32>
    %42 = vector.broadcast %41 : vector<12x1xf32> to vector<12x32xf32>
    %43 = arith.addf %40, %42 : vector<12x32xf32>
    %44 = arith.mulf %19, %43 : vector<12x32xf32>
    %45 = arith.addf %31, %44 : vector<12x32xf32>
    %c0_42 = arith.constant 0 : index
    %c0_43 = arith.constant 0 : index
    %46 = vector.load %arg19[%c0_42, %c0_43] : memref<8x12xf32, #tpu.memory_space<vmem>>, vector<8x12xf32>
    %cst_44 = arith.constant dense<0.000000e+00> : vector<8x32xf32>
    %47 = tpu.matmul %46, %45, %cst_44 {dimension_numbers = #tpu.dot_dimension_numbers<[1], [0], [0], [1], [0, 0, 1, 1], [], []>} : vector<8x12xf32>, vector<12x32xf32>, vector<8x32xf32> -> vector<8x32xf32>
    %c0_45 = arith.constant 0 : index
    %c0_46 = arith.constant 0 : index
    %48 = vector.load %arg20[%c0_45, %c0_46] : memref<8x1xf32, #tpu.memory_space<vmem>>, vector<8x1xf32>
    %49 = vector.broadcast %48 : vector<8x1xf32> to vector<8x32xf32>
    %50 = arith.addf %47, %49 : vector<8x32xf32>
    %cst_47 = arith.constant 0.000000e+00 : f32
    %51 = vector.broadcast %cst_47 : f32 to vector<8x32xf32>
    %52 = arith.maximumf %50, %51 : vector<8x32xf32>
    %c0_48 = arith.constant 0 : index
    %c0_49 = arith.constant 0 : index
    %53 = vector.load %arg21[%c0_48, %c0_49] : memref<8x8xf32, #tpu.memory_space<vmem>>, vector<8x8xf32>
    %cst_50 = arith.constant dense<0.000000e+00> : vector<8x32xf32>
    %54 = tpu.matmul %53, %52, %cst_50 {dimension_numbers = #tpu.dot_dimension_numbers<[1], [0], [0], [1], [0, 0, 1, 1], [], []>} : vector<8x8xf32>, vector<8x32xf32>, vector<8x32xf32> -> vector<8x32xf32>
    %c0_51 = arith.constant 0 : index
    %c0_52 = arith.constant 0 : index
    %55 = vector.load %arg22[%c0_51, %c0_52] : memref<8x1xf32, #tpu.memory_space<vmem>>, vector<8x1xf32>
    %56 = vector.broadcast %55 : vector<8x1xf32> to vector<8x32xf32>
    %57 = arith.addf %54, %56 : vector<8x32xf32>
    %c0_53 = arith.constant 0 : index
    %c0_54 = arith.constant 0 : index
    %c0_55 = arith.constant 0 : index
    %58 = vector.load %arg38[%c0_53, %c0_54, %c0_55] : memref<1x8x32xf32, #tpu.memory_space<vmem>>, vector<1x8x32xf32>
    %59 = vector.shape_cast %58 : vector<1x8x32xf32> to vector<8x32xf32>
    %60 = vector.shape_cast %57 : vector<8x32xf32> to vector<1x8x32xf32>
    tpu.vector_store %arg38[%c0_53, %c0_54, %c0_55], %60 {strides = array<i32>} : memref<1x8x32xf32, #tpu.memory_space<vmem>>, vector<1x8x32xf32>,
    %c0_56 = arith.constant 0 : index
    %c0_57 = arith.constant 0 : index
    %61 = vector.load %arg23[%c0_56, %c0_57] : memref<4x4xf32, #tpu.memory_space<vmem>>, vector<4x4xf32>
    %cst_58 = arith.constant dense<0.000000e+00> : vector<4x32xf32>
    %62 = tpu.matmul %61, %0, %cst_58 {dimension_numbers = #tpu.dot_dimension_numbers<[1], [0], [0], [1], [0, 0, 1, 1], [], []>} : vector<4x4xf32>, vector<4x32xf32>, vector<4x32xf32> -> vector<4x32xf32>
    %c0_59 = arith.constant 0 : index
    %c0_60 = arith.constant 0 : index
    %63 = vector.load %arg24[%c0_59, %c0_60] : memref<4x4xf32, #tpu.memory_space<vmem>>, vector<4x4xf32>
    %cst_61 = arith.constant dense<0.000000e+00> : vector<4x32xf32>
    %64 = tpu.matmul %63, %2, %cst_61 {dimension_numbers = #tpu.dot_dimension_numbers<[1], [0], [0], [1], [0, 0, 1, 1], [], []>} : vector<4x4xf32>, vector<4x32xf32>, vector<4x32xf32> -> vector<4x32xf32>
    %65 = arith.addf %62, %64 : vector<4x32xf32>
    %c0_62 = arith.constant 0 : index
    %c0_63 = arith.constant 0 : index
    %66 = vector.load %arg25[%c0_62, %c0_63] : memref<4x1xf32, #tpu.memory_space<vmem>>, vector<4x1xf32>
    %67 = vector.broadcast %66 : vector<4x1xf32> to vector<4x32xf32>
    %68 = arith.addf %65, %67 : vector<4x32xf32>
    %cst_64 = arith.constant 0.000000e+00 : f32
    %69 = vector.broadcast %cst_64 : f32 to vector<4x32xf32>
    %70 = arith.maximumf %68, %69 : vector<4x32xf32>
    %c0_65 = arith.constant 0 : index
    %c0_66 = arith.constant 0 : index
    %71 = vector.load %arg26[%c0_65, %c0_66] : memref<8x4xf32, #tpu.memory_space<vmem>>, vector<8x4xf32>
    %cst_67 = arith.constant dense<0.000000e+00> : vector<8x32xf32>
    %72 = tpu.matmul %71, %70, %cst_67 {dimension_numbers = #tpu.dot_dimension_numbers<[1], [0], [0], [1], [0, 0, 1, 1], [], []>} : vector<8x4xf32>, vector<4x32xf32>, vector<8x32xf32> -> vector<8x32xf32>
    %c0_68 = arith.constant 0 : index
    %c0_69 = arith.constant 0 : index
    %73 = vector.load %arg27[%c0_68, %c0_69] : memref<8x1xf32, #tpu.memory_space<vmem>>, vector<8x1xf32>
    %74 = vector.broadcast %73 : vector<8x1xf32> to vector<8x32xf32>
    %75 = arith.addf %72, %74 : vector<8x32xf32>
    %c0_70 = arith.constant 0 : index
    %c0_71 = arith.constant 0 : index
    %76 = vector.load %arg28[%c0_70, %c0_71] : memref<4x6xf32, #tpu.memory_space<vmem>>, vector<4x6xf32>
    %cst_72 = arith.constant dense<0.000000e+00> : vector<4x32xf32>
    %77 = tpu.matmul %76, %4, %cst_72 {dimension_numbers = #tpu.dot_dimension_numbers<[1], [0], [0], [1], [0, 0, 1, 1], [], []>} : vector<4x6xf32>, vector<6x32xf32>, vector<4x32xf32> -> vector<4x32xf32>
    %c0_73 = arith.constant 0 : index
    %c0_74 = arith.constant 0 : index
    %78 = vector.load %arg29[%c0_73, %c0_74] : memref<4x1xf32, #tpu.memory_space<vmem>>, vector<4x1xf32>
    %79 = vector.broadcast %78 : vector<4x1xf32> to vector<4x32xf32>
    %80 = arith.addf %77, %79 : vector<4x32xf32>
    %cst_75 = arith.constant 0.000000e+00 : f32
    %81 = vector.broadcast %cst_75 : f32 to vector<4x32xf32>
    %82 = arith.maximumf %80, %81 : vector<4x32xf32>
    %c0_76 = arith.constant 0 : index
    %c0_77 = arith.constant 0 : index
    %83 = vector.load %arg30[%c0_76, %c0_77] : memref<8x4xf32, #tpu.memory_space<vmem>>, vector<8x4xf32>
    %cst_78 = arith.constant dense<0.000000e+00> : vector<8x32xf32>
    %84 = tpu.matmul %83, %82, %cst_78 {dimension_numbers = #tpu.dot_dimension_numbers<[1], [0], [0], [1], [0, 0, 1, 1], [], []>} : vector<8x4xf32>, vector<4x32xf32>, vector<8x32xf32> -> vector<8x32xf32>
    %c0_79 = arith.constant 0 : index
    %c0_80 = arith.constant 0 : index
    %85 = vector.load %arg31[%c0_79, %c0_80] : memref<8x1xf32, #tpu.memory_space<vmem>>, vector<8x1xf32>
    %86 = vector.broadcast %85 : vector<8x1xf32> to vector<8x32xf32>
    %87 = arith.addf %84, %86 : vector<8x32xf32>
    %c0_81 = arith.constant 0 : index
    %c0_82 = arith.constant 0 : index
    %88 = vector.load %arg32[%c0_81, %c0_82] : memref<8x8xf32, #tpu.memory_space<vmem>>, vector<8x8xf32>
    %cst_83 = arith.constant dense<0.000000e+00> : vector<8x32xf32>
    %89 = tpu.matmul %88, %87, %cst_83 {dimension_numbers = #tpu.dot_dimension_numbers<[1], [0], [0], [1], [0, 0, 1, 1], [], []>} : vector<8x8xf32>, vector<8x32xf32>, vector<8x32xf32> -> vector<8x32xf32>
    %90 = arith.mulf %75, %89 : vector<8x32xf32>
    %c0_84 = arith.constant 0 : index
    %c0_85 = arith.constant 0 : index
    %91 = vector.load %arg33[%c0_84, %c0_85] : memref<24x8xf32, #tpu.memory_space<vmem>>, vector<24x8xf32>
    %cst_86 = arith.constant dense<0.000000e+00> : vector<24x32xf32>
    %92 = tpu.matmul %91, %90, %cst_86 {dimension_numbers = #tpu.dot_dimension_numbers<[1], [0], [0], [1], [0, 0, 1, 1], [], []>} : vector<24x8xf32>, vector<8x32xf32>, vector<24x32xf32> -> vector<24x32xf32>
    %c0_87 = arith.constant 0 : index
    %c0_88 = arith.constant 0 : index
    %93 = vector.load %arg34[%c0_87, %c0_88] : memref<24x4xf32, #tpu.memory_space<vmem>>, vector<24x4xf32>
    %cst_89 = arith.constant dense<0.000000e+00> : vector<24x32xf32>
    %94 = tpu.matmul %93, %0, %cst_89 {dimension_numbers = #tpu.dot_dimension_numbers<[1], [0], [0], [1], [0, 0, 1, 1], [], []>} : vector<24x4xf32>, vector<4x32xf32>, vector<24x32xf32> -> vector<24x32xf32>
    %95 = arith.addf %92, %94 : vector<24x32xf32>
    %c0_90 = arith.constant 0 : index
    %c0_91 = arith.constant 0 : index
    %c0_92 = arith.constant 0 : index
    %96 = vector.load %arg5[%c0_90, %c0_91, %c0_92] : memref<1x3x32xf32, #tpu.memory_space<vmem>>, vector<1x3x32xf32>
    %97 = vector.shape_cast %96 : vector<1x3x32xf32> to vector<3x32xf32>
    %c0_93 = arith.constant 0 : index
    %c0_94 = arith.constant 0 : index
    %98 = vector.load %arg35[%c0_93, %c0_94] : memref<8x1xf32, #tpu.memory_space<vmem>>, vector<8x1xf32>
    %99 = vector.extract_strided_slice %95 {offsets = [0, 0], sizes = [8, 32], strides = [1, 1]} : vector<24x32xf32> to vector<8x32xf32>
    %100 = vector.extract_strided_slice %97 {offsets = [0, 0], sizes = [1, 32], strides = [1, 1]} : vector<3x32xf32> to vector<1x32xf32>
    %101 = vector.broadcast %100 : vector<1x32xf32> to vector<8x32xf32>
    %102 = arith.mulf %99, %101 : vector<8x32xf32>
    %103 = vector.broadcast %98 : vector<8x1xf32> to vector<8x32xf32>
    %104 = arith.addf %103, %102 : vector<8x32xf32>
    %105 = vector.extract_strided_slice %95 {offsets = [8, 0], sizes = [8, 32], strides = [1, 1]} : vector<24x32xf32> to vector<8x32xf32>
    %106 = vector.extract_strided_slice %97 {offsets = [1, 0], sizes = [1, 32], strides = [1, 1]} : vector<3x32xf32> to vector<1x32xf32>
    %107 = vector.broadcast %106 : vector<1x32xf32> to vector<8x32xf32>
    %108 = arith.mulf %105, %107 : vector<8x32xf32>
    %109 = arith.addf %104, %108 : vector<8x32xf32>
    %110 = vector.extract_strided_slice %95 {offsets = [16, 0], sizes = [8, 32], strides = [1, 1]} : vector<24x32xf32> to vector<8x32xf32>
    %111 = vector.extract_strided_slice %97 {offsets = [2, 0], sizes = [1, 32], strides = [1, 1]} : vector<3x32xf32> to vector<1x32xf32>
    %112 = vector.broadcast %111 : vector<1x32xf32> to vector<8x32xf32>
    %113 = arith.mulf %110, %112 : vector<8x32xf32>
    %114 = arith.addf %109, %113 : vector<8x32xf32>
    %c0_i32 = arith.constant 0 : i32
    %115 = arith.cmpi eq, %arg1, %c0_i32 : i32
    %116 = arith.extui %115 : i1 to i32
    %c0_i32_95 = arith.constant 0 : i32
    %117 = arith.cmpi ne, %116, %c0_i32_95 : i32
    scf.if %117 {
      %cst_101 = arith.constant 0xFF800000 : f32
      %124 = vector.broadcast %cst_101 : f32 to vector<8x32xf32>
      %c0_102 = arith.constant 0 : index
      %c0_103 = arith.constant 0 : index
      %125 = vector.load %arg40[%c0_102, %c0_103] : memref<8x32xf32, #tpu.memory_space<vmem>>, vector<8x32xf32>
      tpu.vector_store %arg40[%c0_102, %c0_103], %124 {strides = array<i32>} : memref<8x32xf32, #tpu.memory_space<vmem>>, vector<8x32xf32>,
    } else {
    }
    %c0_96 = arith.constant 0 : index
    %c0_97 = arith.constant 0 : index
    %118 = vector.load %arg40[%c0_96, %c0_97] : memref<8x32xf32, #tpu.memory_space<vmem>>, vector<8x32xf32>
    %119 = arith.maximumf %118, %114 : vector<8x32xf32>
    %c0_98 = arith.constant 0 : index
    %c0_99 = arith.constant 0 : index
    %120 = vector.load %arg40[%c0_98, %c0_99] : memref<8x32xf32, #tpu.memory_space<vmem>>, vector<8x32xf32>
    tpu.vector_store %arg40[%c0_98, %c0_99], %119 {strides = array<i32>} : memref<8x32xf32, #tpu.memory_space<vmem>>, vector<8x32xf32>,
    %c7_i32 = arith.constant 7 : i32
    %121 = arith.cmpi eq, %arg1, %c7_i32 : i32
    %122 = arith.extui %121 : i1 to i32
    %c0_i32_100 = arith.constant 0 : i32
    %123 = arith.cmpi ne, %122, %c0_i32_100 : i32
    scf.if %123 {
      %c0_101 = arith.constant 0 : index
      %c0_102 = arith.constant 0 : index
      %124 = vector.load %arg40[%c0_101, %c0_102] : memref<8x32xf32, #tpu.memory_space<vmem>>, vector<8x32xf32>
      %c0_103 = arith.constant 0 : index
      %c0_104 = arith.constant 0 : index
      %125 = vector.load %arg36[%c0_103, %c0_104] : memref<8x1xf32, #tpu.memory_space<vmem>>, vector<8x1xf32>
      %126 = vector.broadcast %125 : vector<8x1xf32> to vector<8x32xf32>
      %127 = arith.mulf %124, %126 : vector<8x32xf32>
      %c0_105 = arith.constant 0 : index
      %c0_106 = arith.constant 0 : index
      %128 = vector.load %arg37[%c0_105, %c0_106] : memref<8x1xf32, #tpu.memory_space<vmem>>, vector<8x1xf32>
      %129 = vector.broadcast %128 : vector<8x1xf32> to vector<8x32xf32>
      %130 = arith.addf %127, %129 : vector<8x32xf32>
      %cst_107 = arith.constant 0.000000e+00 : f32
      %131 = vector.broadcast %cst_107 : f32 to vector<8x32xf32>
      %132 = arith.maximumf %130, %131 : vector<8x32xf32>
      %c0_108 = arith.constant 0 : index
      %c0_109 = arith.constant 0 : index
      %133 = vector.load %arg39[%c0_108, %c0_109] : memref<8x32xf32, #tpu.memory_space<vmem>>, vector<8x32xf32>
      tpu.vector_store %arg39[%c0_108, %c0_109], %132 {strides = array<i32>} : memref<8x32xf32, #tpu.memory_space<vmem>>, vector<8x32xf32>,
    } else {
    }
    return
  }
  func.func @transform_0(%arg0: i32, %arg1: i32) -> (i32, i32) {
    %c0_i32 = arith.constant 0 : i32
    %c0_i32_0 = arith.constant 0 : i32
    return %c0_i32, %arg0 : i32, i32
  }
  func.func @transform_1(%arg0: i32, %arg1: i32) -> (i32, i32, i32) {
    %c0_i32 = arith.constant 0 : i32
    %c0_i32_0 = arith.constant 0 : i32
    return %arg1, %c0_i32, %arg0 : i32, i32, i32
  }
  func.func @transform_2(%arg0: i32, %arg1: i32) -> (i32, i32, i32) {
    %c0_i32 = arith.constant 0 : i32
    %c0_i32_0 = arith.constant 0 : i32
    return %arg1, %c0_i32, %arg0 : i32, i32, i32
  }
  func.func @transform_3(%arg0: i32, %arg1: i32) -> (i32, i32, i32) {
    %c0_i32 = arith.constant 0 : i32
    %c0_i32_0 = arith.constant 0 : i32
    return %arg1, %c0_i32, %arg0 : i32, i32, i32
  }
  func.func @transform_4(%arg0: i32, %arg1: i32) -> (i32, i32) {
    %c0_i32 = arith.constant 0 : i32
    %c0_i32_0 = arith.constant 0 : i32
    %c0_i32_1 = arith.constant 0 : i32
    return %c0_i32, %c0_i32_0 : i32, i32
  }
  func.func @transform_5(%arg0: i32, %arg1: i32) -> (i32, i32) {
    %c0_i32 = arith.constant 0 : i32
    %c0_i32_0 = arith.constant 0 : i32
    %c0_i32_1 = arith.constant 0 : i32
    return %c0_i32, %c0_i32_0 : i32, i32
  }
  func.func @transform_6(%arg0: i32, %arg1: i32) -> (i32, i32) {
    %c0_i32 = arith.constant 0 : i32
    %c0_i32_0 = arith.constant 0 : i32
    %c0_i32_1 = arith.constant 0 : i32
    return %c0_i32, %c0_i32_0 : i32, i32
  }
  func.func @transform_7(%arg0: i32, %arg1: i32) -> (i32, i32) {
    %c0_i32 = arith.constant 0 : i32
    %c0_i32_0 = arith.constant 0 : i32
    %c0_i32_1 = arith.constant 0 : i32
    return %c0_i32, %c0_i32_0 : i32, i32
  }
  func.func @transform_8(%arg0: i32, %arg1: i32) -> (i32, i32) {
    %c0_i32 = arith.constant 0 : i32
    %c0_i32_0 = arith.constant 0 : i32
    %c0_i32_1 = arith.constant 0 : i32
    return %c0_i32, %c0_i32_0 : i32, i32
  }
  func.func @transform_9(%arg0: i32, %arg1: i32) -> (i32, i32) {
    %c0_i32 = arith.constant 0 : i32
    %c0_i32_0 = arith.constant 0 : i32
    %c0_i32_1 = arith.constant 0 : i32
    return %c0_i32, %c0_i32_0 : i32, i32
  }
  func.func @transform_10(%arg0: i32, %arg1: i32) -> (i32, i32) {
    %c0_i32 = arith.constant 0 : i32
    %c0_i32_0 = arith.constant 0 : i32
    %c0_i32_1 = arith.constant 0 : i32
    return %c0_i32, %c0_i32_0 : i32, i32
  }
  func.func @transform_11(%arg0: i32, %arg1: i32) -> (i32, i32) {
    %c0_i32 = arith.constant 0 : i32
    %c0_i32_0 = arith.constant 0 : i32
    %c0_i32_1 = arith.constant 0 : i32
    return %c0_i32, %c0_i32_0 : i32, i32
  }
  func.func @transform_12(%arg0: i32, %arg1: i32) -> (i32, i32) {
    %c0_i32 = arith.constant 0 : i32
    %c0_i32_0 = arith.constant 0 : i32
    %c0_i32_1 = arith.constant 0 : i32
    return %c0_i32, %c0_i32_0 : i32, i32
  }
  func.func @transform_13(%arg0: i32, %arg1: i32) -> (i32, i32) {
    %c0_i32 = arith.constant 0 : i32
    %c0_i32_0 = arith.constant 0 : i32
    %c0_i32_1 = arith.constant 0 : i32
    return %c0_i32, %c0_i32_0 : i32, i32
  }
  func.func @transform_14(%arg0: i32, %arg1: i32) -> (i32, i32) {
    %c0_i32 = arith.constant 0 : i32
    %c0_i32_0 = arith.constant 0 : i32
    %c0_i32_1 = arith.constant 0 : i32
    return %c0_i32, %c0_i32_0 : i32, i32
  }
  func.func @transform_15(%arg0: i32, %arg1: i32) -> (i32, i32) {
    %c0_i32 = arith.constant 0 : i32
    %c0_i32_0 = arith.constant 0 : i32
    %c0_i32_1 = arith.constant 0 : i32
    return %c0_i32, %c0_i32_0 : i32, i32
  }
  func.func @transform_16(%arg0: i32, %arg1: i32) -> (i32, i32) {
    %c0_i32 = arith.constant 0 : i32
    %c0_i32_0 = arith.constant 0 : i32
    %c0_i32_1 = arith.constant 0 : i32
    return %c0_i32, %c0_i32_0 : i32, i32
  }
  func.func @transform_17(%arg0: i32, %arg1: i32) -> (i32, i32) {
    %c0_i32 = arith.constant 0 : i32
    %c0_i32_0 = arith.constant 0 : i32
    %c0_i32_1 = arith.constant 0 : i32
    return %c0_i32, %c0_i32_0 : i32, i32
  }
  func.func @transform_18(%arg0: i32, %arg1: i32) -> (i32, i32) {
    %c0_i32 = arith.constant 0 : i32
    %c0_i32_0 = arith.constant 0 : i32
    %c0_i32_1 = arith.constant 0 : i32
    return %c0_i32, %c0_i32_0 : i32, i32
  }
  func.func @transform_19(%arg0: i32, %arg1: i32) -> (i32, i32) {
    %c0_i32 = arith.constant 0 : i32
    %c0_i32_0 = arith.constant 0 : i32
    %c0_i32_1 = arith.constant 0 : i32
    return %c0_i32, %c0_i32_0 : i32, i32
  }
  func.func @transform_20(%arg0: i32, %arg1: i32) -> (i32, i32) {
    %c0_i32 = arith.constant 0 : i32
    %c0_i32_0 = arith.constant 0 : i32
    %c0_i32_1 = arith.constant 0 : i32
    return %c0_i32, %c0_i32_0 : i32, i32
  }
  func.func @transform_21(%arg0: i32, %arg1: i32) -> (i32, i32) {
    %c0_i32 = arith.constant 0 : i32
    %c0_i32_0 = arith.constant 0 : i32
    %c0_i32_1 = arith.constant 0 : i32
    return %c0_i32, %c0_i32_0 : i32, i32
  }
  func.func @transform_22(%arg0: i32, %arg1: i32) -> (i32, i32) {
    %c0_i32 = arith.constant 0 : i32
    %c0_i32_0 = arith.constant 0 : i32
    %c0_i32_1 = arith.constant 0 : i32
    return %c0_i32, %c0_i32_0 : i32, i32
  }
  func.func @transform_23(%arg0: i32, %arg1: i32) -> (i32, i32) {
    %c0_i32 = arith.constant 0 : i32
    %c0_i32_0 = arith.constant 0 : i32
    %c0_i32_1 = arith.constant 0 : i32
    return %c0_i32, %c0_i32_0 : i32, i32
  }
  func.func @transform_24(%arg0: i32, %arg1: i32) -> (i32, i32) {
    %c0_i32 = arith.constant 0 : i32
    %c0_i32_0 = arith.constant 0 : i32
    %c0_i32_1 = arith.constant 0 : i32
    return %c0_i32, %c0_i32_0 : i32, i32
  }
  func.func @transform_25(%arg0: i32, %arg1: i32) -> (i32, i32) {
    %c0_i32 = arith.constant 0 : i32
    %c0_i32_0 = arith.constant 0 : i32
    %c0_i32_1 = arith.constant 0 : i32
    return %c0_i32, %c0_i32_0 : i32, i32
  }
  func.func @transform_26(%arg0: i32, %arg1: i32) -> (i32, i32) {
    %c0_i32 = arith.constant 0 : i32
    %c0_i32_0 = arith.constant 0 : i32
    %c0_i32_1 = arith.constant 0 : i32
    return %c0_i32, %c0_i32_0 : i32, i32
  }
  func.func @transform_27(%arg0: i32, %arg1: i32) -> (i32, i32) {
    %c0_i32 = arith.constant 0 : i32
    %c0_i32_0 = arith.constant 0 : i32
    %c0_i32_1 = arith.constant 0 : i32
    return %c0_i32, %c0_i32_0 : i32, i32
  }
  func.func @transform_28(%arg0: i32, %arg1: i32) -> (i32, i32) {
    %c0_i32 = arith.constant 0 : i32
    %c0_i32_0 = arith.constant 0 : i32
    %c0_i32_1 = arith.constant 0 : i32
    return %c0_i32, %c0_i32_0 : i32, i32
  }
  func.func @transform_29(%arg0: i32, %arg1: i32) -> (i32, i32) {
    %c0_i32 = arith.constant 0 : i32
    %c0_i32_0 = arith.constant 0 : i32
    %c0_i32_1 = arith.constant 0 : i32
    return %c0_i32, %c0_i32_0 : i32, i32
  }
  func.func @transform_30(%arg0: i32, %arg1: i32) -> (i32, i32) {
    %c0_i32 = arith.constant 0 : i32
    %c0_i32_0 = arith.constant 0 : i32
    %c0_i32_1 = arith.constant 0 : i32
    return %c0_i32, %c0_i32_0 : i32, i32
  }
  func.func @transform_31(%arg0: i32, %arg1: i32) -> (i32, i32) {
    %c0_i32 = arith.constant 0 : i32
    %c0_i32_0 = arith.constant 0 : i32
    %c0_i32_1 = arith.constant 0 : i32
    return %c0_i32, %c0_i32_0 : i32, i32
  }
  func.func @transform_32(%arg0: i32, %arg1: i32) -> (i32, i32) {
    %c0_i32 = arith.constant 0 : i32
    %c0_i32_0 = arith.constant 0 : i32
    %c0_i32_1 = arith.constant 0 : i32
    return %c0_i32, %c0_i32_0 : i32, i32
  }
  func.func @transform_33(%arg0: i32, %arg1: i32) -> (i32, i32) {
    %c0_i32 = arith.constant 0 : i32
    %c0_i32_0 = arith.constant 0 : i32
    %c0_i32_1 = arith.constant 0 : i32
    return %c0_i32, %c0_i32_0 : i32, i32
  }
  func.func @transform_34(%arg0: i32, %arg1: i32) -> (i32, i32) {
    %c0_i32 = arith.constant 0 : i32
    %c0_i32_0 = arith.constant 0 : i32
    %c0_i32_1 = arith.constant 0 : i32
    return %c0_i32, %c0_i32_0 : i32, i32
  }
  func.func @transform_35(%arg0: i32, %arg1: i32) -> (i32, i32) {
    %c0_i32 = arith.constant 0 : i32
    %c0_i32_0 = arith.constant 0 : i32
    %c0_i32_1 = arith.constant 0 : i32
    return %c0_i32, %c0_i32_0 : i32, i32
  }
  func.func @transform_36(%arg0: i32, %arg1: i32) -> (i32, i32, i32) {
    %c0_i32 = arith.constant 0 : i32
    %c0_i32_0 = arith.constant 0 : i32
    return %arg1, %c0_i32, %arg0 : i32, i32, i32
  }
  func.func @transform_37(%arg0: i32, %arg1: i32) -> (i32, i32) {
    %c0_i32 = arith.constant 0 : i32
    %c0_i32_0 = arith.constant 0 : i32
    return %c0_i32, %arg0 : i32, i32
  }
}

</mosaic_0001>

<bundles_post_ra>
// kernel: mp_conv_v2_forward.1
= control target key start
LH: loop header
LB: loop body
LE: loop exit
PB: predicated region body
PF: predicated region fallthrough
CT: control target
= control target key end

     0   :  { %s2211_s6 = smov 1   ;;  %s2212_s10 = smov 2   ;;  %s2586_s0 = inlined_call_operand.smem [shape: u32[38], index: -1, kind: input, shape index: {}] }
   0x1   :  { %s2259_s5 = sld [smem:[%s2586_s0]]   ;;  %s2213_s14 = smov 3  }
   0x2   :  { %s2264_s9 = sld [smem:[%s2586_s0 + %s2211_s6]]   ;;  %s2214_s18 = smov 4  }
   0x3   :  { %s2269_s13 = sld [smem:[%s2586_s0 + %s2212_s10]]   ;;  %s2215_s22 = smov 5  }
   0x4   :  { %s2274_s17 = sld [smem:[%s2586_s0 + %s2213_s14]]   ;;  %s2216_s26 = smov 6  }
   0x5   :  { %s2279_s21 = sld [smem:[%s2586_s0 + %s2214_s18]]   ;;  %s2217_s30 = smov 7  }
   0x6   :  { %s2284_s25 = sld [smem:[%s2586_s0 + %s2215_s22]]   ;;  %s2218_s4 = smov 8  }
   0x7   :  { %s2289_s29 = sld [smem:[%s2586_s0 + %s2216_s26]]   ;;  %s2219_s10 = smov 9  }
   0x8   :  { %s2294_s3 = sld [smem:[%s2586_s0 + %s2217_s30]]   ;;  %s2220_s15 = smov 10  }
   0x9   :  { %s2299_s8 = sld [smem:[%s2586_s0 + %s2218_s4]]   ;;  %s2221_s20 = smov 11  }
   0xa   :  { %2595 = sst [smem:[#allocation3_spill]] %s2274_s17  ;;  %s2222_s26 = smov 12  }
   0xb   :  { %s2304_s14 = sld [smem:[%s2586_s0 + %s2219_s10]]   ;;  %s2223_s1 = smov 13  }
   0xc   :  { %s2309_s19 = sld [smem:[%s2586_s0 + %s2220_s15]]   ;;  %s2224_s7 = smov 14  }
   0xd   :  { %s2314_s24 = sld [smem:[%s2586_s0 + %s2221_s20]]   ;;  %s2225_s15 = smov 15  }
   0xe   :  { %2596 = sst [smem:[#allocation4_spill]] %s2294_s3  ;;  %s2226_s22 = smov 16  }
   0xf   :  { %s2319_s30 = sld [smem:[%s2586_s0 + %s2222_s26]]   ;;  %s2227_s28 = smov 17  }
  0x10   :  { %s2324_s6 = sld [smem:[%s2586_s0 + %s2223_s1]]   ;;  %s2448_s10 = smov 0  }
  0x11   :  { %s2329_s12 = sld [smem:[%s2586_s0 + %s2224_s7]]   ;;  %s2228_s7 = smov 18  }
  0x12   :  { %s2334_s20 = sld [smem:[%s2586_s0 + %s2225_s15]]   ;;  %s2229_s15 = smov 19  }
  0x13   :  { %2597 = sst [smem:[#allocation5_spill]] %s2314_s24  ;;  %s2450_s11 = smov 0  }
  0x14   :  { %s2339_s27 = sld [smem:[%s2586_s0 + %s2226_s22]]   ;;  %s2230_s22 = smov 20  }
  0x15   :  { %s2344_s4 = sld [smem:[%s2586_s0 + %s2227_s28]]   ;;  %s2231_s28 = smov 21  }
  0x16   :  { %s2349_s17 = sld [smem:[%s2586_s0 + %s2228_s7]]   ;;  %s2232_s7 = smov 22  }
  0x17   :  { %s2354_s24 = sld [smem:[%s2586_s0 + %s2229_s15]]   ;;  %s2233_s15 = smov 23  }
  0x18   :  { %2598 = sst [smem:[#allocation6_spill]] %s2334_s20 }
  0x19   :  { %s2359_s20 = sld [smem:[%s2586_s0 + %s2230_s22]]   ;;  %s2234_s22 = smov 24  }
  0x1a   :  { %s2369_s3 = sld [smem:[%s2586_s0 + %s2232_s7]]   ;;  %s2236_s7 = smov 26  }
  0x1b   :  { %2599 = sst [smem:[#allocation7_spill]] %s2344_s4 }
  0x1c   :  { %2600 = sst [smem:[#allocation8_spill]] %s2349_s17 }
  0x1d   :  { %2601 = sst [smem:[#allocation9_spill]] %s2354_s24 }
  0x1e   :  { %s2364_s4 = sld [smem:[%s2586_s0 + %s2231_s28]]   ;;  %s2235_s28 = smov 25  }
  0x1f   :  { %2602 = sst [smem:[#allocation10_spill]] %s2359_s20 }
  0x20   :  { %2604 = sst [smem:[#allocation12_spill]] %s2369_s3 }
  0x21   :  { %s2374_s24 = sld [smem:[%s2586_s0 + %s2233_s15]]   ;;  %s2237_s15 = smov 27  }
  0x22   :  { %s2379_s20 = sld [smem:[%s2586_s0 + %s2234_s22]]   ;;  %s2238_s22 = smov 28  }
  0x23   :  { %s2389_s3 = sld [smem:[%s2586_s0 + %s2236_s7]]   ;;  %s2240_s7 = smov 30  }
  0x24   :  { %2603 = sst [smem:[#allocation11_spill]] %s2364_s4 }
  0x25   :  { %s2384_s4 = sld [smem:[%s2586_s0 + %s2235_s28]]   ;;  %s2239_s28 = smov 29  }
  0x27   :  { %2605 = sst [smem:[#allocation13_spill]] %s2374_s24 }
  0x28   :  { %2606 = sst [smem:[#allocation14_spill]] %s2379_s20 }
  0x29   :  { %2608 = sst [smem:[#allocation16_spill]] %s2389_s3 }
  0x2a   :  { %s2394_s24 = sld [smem:[%s2586_s0 + %s2237_s15]]   ;;  %s2241_s15 = smov 31  }
  0x2b   :  { %2607 = sst [smem:[#allocation15_spill]] %s2384_s4 }
  0x2c   :  { %s2399_s20 = sld [smem:[%s2586_s0 + %s2238_s22]]   ;;  %s2242_s22 = smov 32  }
  0x2d   :  { %s2404_s4 = sld [smem:[%s2586_s0 + %s2239_s28]]   ;;  %s2243_s28 = smov 33  }
  0x2e   :  { %s2409_s3 = sld [smem:[%s2586_s0 + %s2240_s7]]   ;;  %s2244_s7 = smov 34  }
  0x2f   :  { %s2414_s17 = sld [smem:[%s2586_s0 + %s2241_s15]]   ;;  %s2245_s15 = smov 35  }
  0x32   :  { %2609 = sst [smem:[#allocation17_spill]] %s2399_s20 }
  0x33   :  { %2610 = sst [smem:[#allocation18_spill]] %s2404_s4 }
  0x34   :  { %2611 = sst [smem:[#allocation19_spill]] %s2409_s3 }
  0x35   :  { %2612 = sst [smem:[#allocation20_spill]] %s2414_s17 }
  0x36   :  { %s2419_s20 = sld [smem:[%s2586_s0 + %s2242_s22]]   ;;  %s2246_s22 = smov 36  }
  0x37   :  { %s2424_s4 = sld [smem:[%s2586_s0 + %s2243_s28]]   ;;  %s2247_s28 = smov 37  }
  0x38   :  { %s2429_s3 = sld [smem:[%s2586_s0 + %s2244_s7]]   ;;  %s2446_s7 = smov 0  }
  0x39   :  { %s2434_s17 = sld [smem:[%s2586_s0 + %s2245_s15]]  }
  0x3c   :  { %2613 = sst [smem:[#allocation21_spill]] %s2419_s20 }
  0x3d   :  { %2614 = sst [smem:[#allocation22_spill]] %s2424_s4 }
  0x3e   :  { %s2439_s20 = sld [smem:[%s2586_s0 + %s2246_s22]]  }
  0x3f   :  { %s2444_s4 = sld [smem:[%s2586_s0 + %s2247_s28]]  }
  0x40 LB: > { %s95_s0 = sadd.s32 1, %s2205_s10  ;;  %p2070_p0 = scmp.ge.s32.totalorder %s2209_s11, 1  ;;  %s2209_s11 = sphi %s2450_s11, %s86_s11   ;;  %s2205_s10 = sphi %s2448_s10, %s2638_s10   ;;  %s2201_s7 = sphi %s2446_s7, %s2637_s7  }
  0x41   : > { %p96_p1 = scmp.ge.s32.totalorder %s95_s0, 8  ;;  %p1083_p2 = scmp.lt.s32.totalorder %s2209_s11, 9 }
  0x43   : > { %s2640_s0 = smov (%p96_p1, %s95_s0), 0  ;;  %p1084_p3 = pnand %p2070_p0, %p1083_p2 }
  0x44   : > { %p1205_p4 = scmp.lt.s32.totalorder (!%p1084_p3), %s2201_s7, 7  ;;  %s2615_s26 = sld [smem:[#allocation8_spill]] (!%p1084_p3) }
  0x45   : > { %1087 = sbr.rel (%p1084_p3) target bundleno = 946 (0x3b2), region = 164  ;;  %s2616_s28 = sld [smem:[#allocation18_spill]] (!%p1084_p3) }
  0x46   : > { %s2617_s1 = sld [smem:[#allocation15_spill]] (!%p1084_p3)  ;;  %p2113_p5 = scmp.ne.s32.totalorder (!%p1084_p3), %s2201_s7, 0 }
  0x47   : > { %s2618_s2 = sld [smem:[#allocation10_spill]] (!%p1084_p3) }
  0x4a   : > { %v2467_v0 = vld [vmem:[%s2259_s5] sm:$0xf]  ;;  %vm1246_vm0 = vcmask 1043456   ;;  %v2248_v2 = vmov 0   ;;  %vm1242_vm1 = vcmask 31744   ;;  %s2477_s15 = scalar_select %p1205_p4, %s2201_s7, 7 }
  0x4b   : > { %v1296_v1 = vld [vmem:[%s2289_s29] sm:$0x3f]  ;;  %2183 = vset.pattern.permute.xlu0 %v2248_v2  ;;  %2077 = vmatpush.msk.msra.mxu1 %vm1246_vm0, %v2467_v0  ;;  %vm1325_vm2 = vcmask 1045504   ;;  %vm1318_vm3 = vcmask 48128   ;;  %v1307_v10 = vld [vmem:[%s2299_s8 + $0x8] sm:$0xf] }
  0x4c   : > { %v1240_v3 = vld [vmem:[%s2279_s21] sm:$0x3f]  ;;  %1299 = vperm.xlu0 %2183, %v1296_v1   ;;  %2184 = vset.pattern.permute.xlu1 %v2248_v2  ;;  %s2592_s16 = sshll.u32 %s2477_s15, 2  ;;  %s2593_s18 = sshll.u32 %s2477_s15, 3  ;;  %v1389_v11 = vld [vmem:[%s2319_s30 + $0x8] sm:$0xf] }
  0x4d   : > { %v1353_v4 = vld [vmem:[%s2309_s19] sm:$0x3f]  ;;  %2078 = vmatmul.msk.f32.vlgmr.msra.gmra.mxu1 %vm1242_vm1, %v1240_v3  ;;  %2185 = vset.pattern.permute.xlu2 %v2248_v2  ;;  %s1211_s22 = scalar_lea.vmem %s2264_s9, %s2592_s16  ;;  %s1218_s23 = scalar_lea.vmem %s2269_s13, %s2593_s18  ;;  %v1466_v19 = vld [vmem:[%s2339_s27 + $0x8] sm:$0xf]  ;;  %vm1520_vm4 = vcmask 97280   ;;  %vm1555_vm5 = vcmask 64512  }
  0x4e   : > { %1356 = vperm.xlu1 %2184, %v1353_v4   ;;  %v1241_v5 = vld [vmem:[%s2284_s25] sm:$0x3f]  ;;  %1474 = vperm.xlu2 %2185, %v1466_v19   ;;  %s2629_s16 = sld [smem:[#allocation9_spill]]  ;;  %vm1579_vm6 = vcmask 261120  }
  0x4f   : > { %v1433_v6 = vld [vmem:[%s2329_s12] sm:$0x3f]  ;;  %s2630_s18 = sld [smem:[#allocation19_spill]] }
  0x50   : > { %v1238_v7 = vld [vmem:[%s1211_s22] sm:$0xf]  ;;  %s2619_s22 = sld [smem:[#allocation4_spill]] }
  0x51   : > { %v1352_v8 = vld [vmem:[%s2304_s14] sm:$0x3f]  ;;  %2075 = vmatpush.msk.msra.mxu0 %vm1246_vm0, %v1238_v7 }
  0x52   : > { %v1239_v9 = vld [vmem:[%s1218_s23] sm:$0x3f]  ;;  %2076 = vmatmul.msk.f32.vlgmr.msra.gmra.mxu0 %vm1242_vm1, %v1241_v5  ;;  %s2620_s23 = sld [smem:[#allocation13_spill]] }
  0x53   : > { %2082 = vmatpush.msk.msrb.mxu1 %vm1325_vm2, %v1239_v9  ;;  %v1432_v12 = vld [vmem:[%s2324_s6] sm:$0x3f] }
  0x54   : > { %1436 = vperm.xlu0 %2183, %v1433_v6   ;;  %v1465_v13 = vld [vmem:[%s2339_s27] sm:$0xff] }
  0x55   : > { %2083 = vmatmul.msk.f32.vlgmr.msrb.gmra.mxu1 %vm1318_vm3, %v1352_v8  ;;  %v1671_v14 = vld [vmem:[%s2394_s24] sm:$0xf] }
  0x56   : > { %2087 = vmatpush.msk.msra.mxu1 %vm1325_vm2, %v1239_v9  ;;  %1315 = vperm.xlu1 %2184, %v1307_v10   ;;  %v1514_v15 = vld [vmem:[%s2615_s26] sm:$0xff]  ;;  %s2621_s26 = sld [smem:[#allocation6_spill]]  ;;  %v1305_v33 = vld [vmem:[%s2619_s22 + $0x8] sm:$0xf] }
  0x57   : > { %v1702_v16 = vld [vmem:[%s2616_s28] sm:$0xff]  ;;  %s2622_s28 = sld [smem:[#allocation5_spill]] }
  0x58   : > { %v1638_v17 = vld [vmem:[%s2617_s1] sm:$0xff]  ;;  %s2623_s1 = sld [smem:[#allocation22_spill]] }
  0x59   : > { %v1549_v18 = vld [vmem:[%s2618_s2] sm:$0xff]  ;;  %s2624_s2 = sld [smem:[#allocation16_spill]] }
  0x5a   : > { %v1306_v20 = vld [vmem:[%s2299_s8] sm:$0xff] }
  0x5b   : > { %1310 = vperm.xlu2 %2185, %v1306_v20   ;;  %v1388_v23 = vld [vmem:[%s2319_s30] sm:$0xff] }
  0x5c   : > { %1397 = vperm.xlu0 %2183, %v1389_v11   ;;  %v1304_v32 = vld [vmem:[%s2619_s22] sm:$0xff]  ;;  %v1464_v42 = vld [vmem:[%s2621_s26 + $0x8] sm:$0xf] }
  0x5d   : > { %2088 = vmatmul.msk.f32.vlgmr.msra.gmra.mxu1 %vm1318_vm3, %v1432_v12  ;;  %v1629_v34 = vld [vmem:[%s2620_s23] sm:$0xf]  ;;  %s2625_s23 = sld [smem:[#allocation12_spill]]  ;;  %v1387_v43 = vld [vmem:[%s2622_s28 + $0x8] sm:$0xf] }
  0x5e   : > { %1469 = vperm.xlu1 %2184, %v1465_v13   ;;  %v1463_v39 = vld [vmem:[%s2621_s26] sm:$0xff] }
  0x5f   : > { %v1386_v40 = vld [vmem:[%s2622_s28] sm:$0xff] }
  0x60   : > { %v1836_v41 = vld [vmem:[%s2623_s1] sm:$0xff]  ;;  %s2626_s1 = sld [smem:[#allocation7_spill]] }
  0x61   : > { %v1670_v44 = vld [vmem:[%s2624_s2] sm:$0xf]  ;;  %s2627_s2 = sld [smem:[#allocation17_spill]] }
  0x63   : > { %1392 = vperm.xlu2 %2185, %v1388_v23   ;;  %v1582_v45 = vld [vmem:[%s2625_s23] sm:$0xf]  ;;  %s2628_s23 = sld [smem:[#allocation11_spill]] }
  0x64   : > { %1674 = vperm.xlu0 %2183, %v1671_v14  }
  0x66   : > { %1517 = vperm.xlu1 %2184, %v1514_v15   ;;  %v1513_v5 = vld [vmem:[%s2626_s1] sm:$0xff]  ;;  %s2631_s1 = sld [smem:[#allocation14_spill]] }
  0x67   : > { %v1701_v10 = vld [vmem:[%s2627_s2] sm:$0xff]  ;;  %s2632_s2 = sld [smem:[#allocation21_spill]] }
  0x69   : > { %v1581_v11 = vld [vmem:[%s2628_s23] sm:$0xf] }
  0x6b   : > { %1632 = vperm.xlu2 %2185, %v1629_v34  }
  0x6c   : > { %1705 = vperm.xlu0 %2183, %v1702_v16  }
  0x6e   : > { %1641 = vperm.xlu1 %2184, %v1638_v17   ;;  %v1548_v17 = vld [vmem:[%s2629_s16] sm:$0xff]  ;;  %s2633_s16 = sld [smem:[#allocation20_spill]] }
  0x73   : > { %1841 = vperm.xlu2 %2185, %v1836_v41  }
  0x74   : > { %1552 = vperm.xlu0 %2183, %v1549_v18  }
  0xa8   : > { %v1475_v47 = vpop.permute.xlu2 %1474 }
  0xb5   : > { %v1311_v51 = vpop.permute.xlu2 %1310 }
  0xbd   : > { %v1393_v1 = vpop.permute.xlu2 %1392 }
  0xbe   : > { %v1300_v22 = vpop.permute.xlu0 %1299 }
  0xc0   : > { %v1357_v25 = vpop.permute.xlu1 %1356 }
  0xc6   : > { %v1437_v35 = vpop.permute.xlu0 %1436 }
  0xc8   : > { %v1316_v48 = vpop.permute.xlu1 %1315 }
  0xca   : > { %v1293_v21 = vpop.f32.mrf.mxu1 }
  0xce   : > { %v1398_v52 = vpop.permute.xlu0 %1397 }
  0xcf   : > { %v1267_v24 = vpop.f32.mrf.mxu0 }
  0xd0   : > { %v1294_v26 = vadd.f32 %v1293_v21, %v1267_v24  ;;  %v1470_v53 = vpop.permute.xlu1 %1469  ;;  %v1734_v21 = vld [vmem:[%s2630_s18] sm:$0xff]  ;;  %v1633_v24 = vpop.permute.xlu2 %1632  ;;  %s2634_s18 = sshll.u32 %s2477_s15, 3 }
  0xd1   : > { %s1232_s23 = scalar_lea.vmem %s2439_s20, %s2634_s18  ;;  %s2636_s18 = sshll.u32 %s2477_s15, 2 }
  0xd2   : > { %v1382_v27 = vpop.f32.mrf.mxu1  ;;  %v1302_v29 = vadd.f32 %v1300_v22, %v1294_v26 }
  0xd3   : > { %v1383_v28 = vadd.f32 %v1382_v27, %v1357_v25  ;;  %v1637_v27 = vld [vmem:[%s2631_s1] sm:$0xff]  ;;  %s2635_s1 = sld [smem:[#allocation3_spill]] }
  0xd4   : > { %v1303_v30 = vmax.f32 %v1302_v29, 0.0  ;;  %v1763_v29 = vld [vmem:[%s2632_s2 + $0x8] sm:$0xff] }
  0xd5   : > { %v1385_v31 = vmax.f32 %v1383_v28, 0.0  ;;  %v1762_v28 = vld [vmem:[%s2632_s2] sm:$0xff] }
  0xd6   : > { %2079 = vmatpush.msk.msrb.mxu0 %vm1325_vm2, %v1303_v30  ;;  %2118 = vmatpush.msk.msra.mxu2 %vm1325_vm2, %v1303_v30  ;;  %v1675_v6 = vpop.permute.xlu0 %1674  ;;  %v1764_v30 = vld [vmem:[%s2632_s2 + $0x10] sm:$0xff] }
  0xd7   : > { %2080 = vmatmul.msk.f32.vlgmr.msrb.gmra.mxu0 %vm1318_vm3, %v1304_v32  ;;  %2081 = vmatmul.msk.f32.vlgmr.msra.gmra.mxu2 %vm1318_vm3, %v1305_v33 }
  0xd8   : > { %2084 = vmatpush.msk.msra.mxu0 %vm1325_vm2, %v1385_v31  ;;  %v1518_v13 = vpop.permute.xlu1 %1517 }
  0xd9   : > { %s1225_s2 = scalar_lea.vmem %s2635_s1, %s2636_s18 }
  0xda   : > { %v1459_v36 = vpop.f32.mrf.mxu1  ;;  %2095 = vmatpush.msk.msrb.mxu0 %vm1246_vm0, %v1238_v7 }
  0xdb   : > { %v1460_v37 = vadd.f32 %v1459_v36, %v1437_v35 }
  0xdd   : > { %v1462_v38 = vmax.f32 %v1460_v37, 0.0 }
  0xde   : > { %v1706_v18 = vpop.permute.xlu0 %1705 }
  0xdf   : > { %2089 = vmatpush.msk.msra.mxu3 %vm1325_vm2, %v1462_v38  ;;  %2085 = vmatmul.msk.f32.vlgmr.msra.gmra.mxu0 %vm1318_vm3, %v1386_v40  ;;  %v1759_v38 = vld [vmem:[%s2633_s16] sm:$0xff]  ;;  %v1761_v40 = vld [vmem:[%s2633_s16 + $0x10] sm:$0xff] }
  0xe0   : > { %2090 = vmatmul.msk.f32.vlgmr.msra.gmra.mxu3 %vm1318_vm3, %v1463_v39  ;;  %v1760_v39 = vld [vmem:[%s2633_s16 + $0x8] sm:$0xff] }
  0xe1   : > { %2101 = vmatpush.msk.msrb.mxu3 %vm1325_vm2, %v1239_v9 }
  0xe6   : > { %v1553_v31 = vpop.permute.xlu0 %1552 }
  0xe7   : > { %2086 = vmatmul.msk.f32.gmra.mxu0 %vm1318_vm3, %v1387_v43 }
  0xe8   : > { %2091 = vmatmul.msk.f32.gmra.mxu3 %vm1318_vm3, %v1464_v42 }
  0xef   : > { %2096 = vmatmul.msk.f32.vlgmr.msrb.gmra.mxu0 %vm1242_vm1, %v1582_v45 }
  0xf0   : > { %2102 = vmatmul.msk.f32.vlgmr.msrb.gmra.mxu3 %vm1318_vm3, %v1670_v44  ;;  %v1835_v44 = vld [vmem:[%s1225_s2] sm:$0x7] }
 0x154   : > { %v1346_v46 = vpop.f32.mrf.mxu0 }
 0x155   : > { %v1347_v58 = vadd.f32 %v1346_v46, %v1311_v51 }
 0x15a   : > { %v1349_v54 = vpop.f32.mrf.mxu2 }
 0x15b   : > { %v1350_v59 = vadd.f32 %v1349_v54, %v1316_v48  ;;  %v1842_v54 = vpop.permute.xlu2 %1841 }
 0x15c   : > { %v1426_v49 = vpop.f32.mrf.mxu0 }
 0x15d   : > { %v1427_v2 = vadd.f32 %v1426_v49, %v1393_v1  ;;  %v1845_v49 = vperm.slane %v1835_v44, 1 }
 0x163   : > { %v1503_v50 = vpop.f32.mrf.mxu3 }
 0x164   : > { %v1504_v55 = vadd.f32 %v1503_v50, %v1470_v53  ;;  %v1429_v56 = vpop.f32.mrf.mxu0  ;;  %v1848_v53 = vperm.slane %v1835_v44, 2 }
 0x165   : > { %v1430_v62 = vadd.f32 %v1429_v56, %v1398_v52 }
 0x166   : > { %v1509_v61 = vmul.f32 %v1504_v55, %v1347_v58 }
 0x168   : > { %v1511_v4 = vadd.f32 %v1509_v61, %v1427_v2 }
 0x16b   : > { %v1506_v57 = vpop.f32.mrf.mxu3 }
 0x16c   : > { %v1507_v60 = vadd.f32 %v1506_v57, %v1475_v47  ;;  %v1603_v12 = vpop.f32.mrf.mxu0  ;;  %v1837_v47 = vperm.slane %v1835_v44, 0 }
 0x16e   : > { %v1510_v63 = vmul.f32 %v1507_v60, %v1350_v59 }
 0x170   : > { %v1512_v3 = vadd.f32 %v1510_v63, %v1430_v62 }
 0x172   : > { %2092 = vmatpush.msk.msrb.mxu1 %vm1246_vm0, %v1512_v3 }
 0x173   : > { %v1697_v7 = vpop.f32.mrf.mxu3 }
 0x174   : > { %v1698_v8 = vadd.f32 %v1697_v7, %v1675_v6  ;;  %1542 = vmatpush.msrb.mxu1 %v1511_v4 }
 0x175   : > { %2093 = vmatmul.msk.f32.vlgmr.msrb.gmra.mxu1 %vm1520_vm4, %v1513_v5 }
 0x176   : > { %v1700_v9 = vmax.f32 %v1698_v8, 0.0  ;;  %2097 = vmatpush.msk.msra.mxu1 %vm1246_vm0, %v2467_v0 }
 0x178   : > { %2103 = vmatpush.msk.msra.mxu0 %vm1246_vm0, %v1700_v9 }
 0x179   : > { %2104 = vmatmul.msk.f32.vlgmr.msra.gmra.mxu0 %vm1242_vm1, %v1701_v10 }
 0x17d   : > { %2098 = vmatmul.msk.f32.vlgmr.msra.gmra.mxu1 %vm1242_vm1, %v1581_v11 }
 0x1f2   : > { %v1544_v14 = vpop.f32.mrf.mxu1 }
 0x1f3   : > { %v1545_v15 = vadd.f32 %v1544_v14, %v1518_v13 }
 0x1f5   : > { %v1547_v16 = vmax.f32 %v1545_v15, 0.0 }
 0x1f6   : > { %v1731_v19 = vpop.f32.mrf.mxu0 }
 0x1f7   : > { %v1732_v20 = vadd.f32 %v1731_v19, %v1706_v18  ;;  %1574 = vmatpush.msrb.mxu2 %v1547_v16 }
 0x1f8   : > { %2094 = vmatmul.msk.f32.vlgmr.msrb.gmra.mxu2 %vm1555_vm5, %v1548_v17 }
 0x1f9   : > { %1753 = vmatpush.msrb.mxu1 %v1732_v20 }
 0x1fa   : > { %v1626_v22 = vpop.f32.mrf.mxu1  ;;  %2105 = vmatmul.msk.f32.vlgmr.msrb.gmra.mxu1 %vm1555_vm5, %v1734_v21 }
 0x1fb   : > { %v1627_v23 = vadd.f32 %v1626_v22, %v1603_v12 }
 0x1fd   : > { %v1635_v25 = vadd.f32 %v1633_v24, %v1627_v23 }
 0x1ff   : > { %v1636_v26 = vmax.f32 %v1635_v25, 0.0 }
 0x201   : > { %2099 = vmatpush.msk.msra.mxu2 %vm1246_vm0, %v1636_v26 }
 0x202   : > { %2100 = vmatmul.msk.f32.vlgmr.msra.gmra.mxu2 %vm1242_vm1, %v1637_v27 }
 0x203   : > { %2106 = vmatpush.msk.msrb.mxu2 %vm1246_vm0, %v2467_v0  ;;  %v1642_v0 = vpop.permute.xlu1 %1641 }
 0x20a   : > { %2107 = vmatmul.msk.f32.vlgmr.msrb.gmra.mxu2 %vm1242_vm1, %v1762_v28 }
 0x212   : > { %2108 = vmatmul.msk.f32.gmra.mxu2 %vm1242_vm1, %v1763_v29 }
 0x21a   : > { %2109 = vmatmul.msk.f32.gmra.mxu2 %vm1242_vm1, %v1764_v30 }
 0x277   : > { %v1755_v35 = vpop.f32.mrf.mxu1 }
 0x27b   : > { %v1576_v32 = vpop.f32.mrf.mxu2 }
 0x27c   : > { %v1577_v33 = vadd.f32 %v1576_v32, %v1553_v31 }
 0x27e   : > { %1580 = vst.msk [vmem:[%s1232_s23] sm:$0xff] %vm1579_vm6, %v1577_v33 }
 0x285   : > { %v1667_v34 = vpop.f32.mrf.mxu2 }
 0x286   : > { %v1668_v36 = vadd.f32 %v1667_v34, %v1642_v0 }
 0x288   : > { %v1758_v37 = vmul.f32 %v1755_v35, %v1668_v36 }
 0x28a   : > { %1824 = vmatpush.msra.mxu3 %v1758_v37 }
 0x28b   : > { %2110 = vmatmul.msk.f32.vlgmr.msra.gmra.mxu3 %vm1555_vm5, %v1759_v38 }
 0x28d   : > { %v1791_v41 = vpop.f32.mrf.mxu2 }
 0x293   : > { %2111 = vmatmul.msk.f32.gmra.mxu3 %vm1555_vm5, %v1760_v39 }
 0x295   : > { %v1794_v43 = vpop.f32.mrf.mxu2 }
 0x29b   : > { %2112 = vmatmul.msk.f32.gmra.mxu3 %vm1555_vm5, %v1761_v40 }
 0x29d   : > { %v1797_v51 = vpop.f32.mrf.mxu2 }
 0x30e   : > { %v1826_v42 = vpop.f32.mrf.mxu3 }
 0x30f   : > { %v1827_v46 = vadd.f32 %v1826_v42, %v1791_v41 }
 0x311   : > { %v1838_v50 = vmul.f32 %v1837_v47, %v1827_v46 }
 0x313   : > { %v1844_v56 = vadd.f32 %v1842_v54, %v1838_v50 }
 0x316   : > { %v1829_v45 = vpop.f32.mrf.mxu3 }
 0x317   : > { %v1830_v48 = vadd.f32 %v1829_v45, %v1794_v43 }
 0x319   : > { %v1846_v52 = vmul.f32 %v1845_v49, %v1830_v48 }
 0x31b   : > { %v1847_v58 = vadd.f32 %v1846_v52, %v1844_v56 }
 0x31e   : > { %v1832_v55 = vpop.f32.mrf.mxu3 }
 0x31f   : > { %v1833_v57 = vadd.f32 %v1832_v55, %v1797_v51  ;;  %1854 = sbr.rel (%p2113_p5) target bundleno = 806 (0x326), region = 168 }
 0x321   : > { %v1849_v59 = vmul.f32 %v1848_v53, %v1833_v57 }
 0x323   : > { %v1850_v60 = vadd.f32 %v1849_v59, %v1847_v58 }
 0x324   : > { %v2249_v61 = vmov -inf  }
 0x325   : > { %1855 = vst.msk [vmem:[#allocation2] sm:$0xff] %vm1579_vm6, %v2249_v61 }
 0x326 PF: > { %p2114_p6 = scmp.ne.s32.totalorder %s2201_s7, 7 }
 0x32b   : > { %1862 = sbr.rel (%p2114_p6) target bundleno = 946 (0x3b2), region = 172 }
 0x32c   : > { %v1856_v62 = vld [vmem:[#allocation2] sm:$0xff] }
 0x32d   : > { %v1857_v63 = vmax.f32 %v1856_v62, %v1850_v60 }
 0x32f   : > { %1858 = vst.msk [vmem:[#allocation2] sm:$0xff] %vm1579_vm6, %v1857_v63 }
 0x330   : > { %v1864_v1 = vld [vmem:[%s2429_s3] sm:$0xff]  ;;  %v2250_v2 = vmov 0  }
 0x331   : > { %2186 = vset.pattern.permute.xlu0 %v2250_v2  ;;  %v1871_v3 = vld [vmem:[%s2434_s17] sm:$0xff] }
 0x332   : > { %1867 = vperm.xlu0 %2186, %v1864_v1  }
 0x336   : > { %v1863_v5 = vld [vmem:[#allocation2] sm:$0xff] }
 0x33a   : > { %1874 = vperm.xlu0 %2186, %v1871_v3  }
 0x3a4   : > { %v1868_v4 = vpop.permute.xlu0 %1867 }
 0x3a5   : > { %v1870_v6 = vmul.f32 %v1868_v4, %v1863_v5 }
 0x3ac   : > { %v1875_v7 = vpop.permute.xlu0 %1874 }
 0x3ad   : > { %v1877_v8 = vadd.f32 %v1875_v7, %v1870_v6 }
 0x3af   : > { %v1878_v9 = vmax.f32 %v1877_v8, 0.0 }
 0x3b1   : > { %1879 = vst.msk [vmem:[%s2444_s4] sm:$0xff] %vm1579_vm6, %v1878_v9 }
 0x3b2 PF: > { %s86_s11 = sadd.s32 1, %s2209_s11   ;;  %s2637_s7 = smov %s2205_s10 }
 0x3b3   : > { %p83_p7 = scmp.ge.s32.totalorder %s86_s11, 10   ;;  %s2638_s10 = smov %s2640_s0 }
 0x3b5   :  { %85 = sbr.rel (!%p83_p7) target bundleno = 64 (0x40), region = 260 }

</bundles_post_ra>
